<compile_context>
chip_gen: v5e
topology: v5e:2x2
jax: 0.10.0
libtpu: 0.0.40
codegen_flags: <defaults>
</compile_context>

<pallas_src>
import jax
import jax.numpy as jnp
from jax.experimental import pallas as pl
from jax.experimental.pallas import tpu as pltpu


# -----------------------------------------------------------------------------
# Path 1 (default): zero-cost identity — no kernel, no donation, no DMA.
# -----------------------------------------------------------------------------
def _identity_noop(z: jax.Array) -> jax.Array:
    # AbstractRegularizer.forward at this level is an identity; its true cost
    # is zero, so the fastest "kernel" is no kernel at all (100% win on launch
    # overhead, and no donated-buffer hazard for callers that reuse `z`).
    return z


# -----------------------------------------------------------------------------
# Path 2 (optional): fresh buffer via one direct HBM->HBM async DMA.
# -----------------------------------------------------------------------------
def _hbm_copy_kernel(z_hbm_ref, o_hbm_ref, sem):
    # Both refs stay in HBM (memory_space=pl.ANY): no VMEM staging, no vregs,
    # no (8,128) block constraints, no double-buffer footprint.  A pure copy
    # never needs the vector units — a single DMA runs the transfer straight
    # at the HBM roofline on v5e / v6e / v7x, independent of any scoped-VMEM
    # limit (in particular v7x's 64 MiB VMEM).
    cp = pltpu.make_async_copy(z_hbm_ref, o_hbm_ref, sem)
    cp.start()
    cp.wait()


def _identity_copy(z: jax.Array) -> jax.Array:
    return pl.pallas_call(
        _hbm_copy_kernel,
        out_shape=jax.ShapeDtypeStruct(z.shape, z.dtype),
        in_specs=[pl.BlockSpec(memory_space=pl.ANY)],
        out_specs=pl.BlockSpec(memory_space=pl.ANY),
        scratch_shapes=[pltpu.SemaphoreType.DMA],
    )(z)


# -----------------------------------------------------------------------------
# Module-level API (mirrors AbstractRegularizer.forward / get_trainable_parameters)
# -----------------------------------------------------------------------------
def abstract_regularizer_forward(z: jax.Array, materialize: bool = False):
    """Pallas equivalent of AbstractRegularizer.forward: returns (z, {}).

    Default path is a zero-cost pass-through of `z`; pass materialize=True to
    get a freshly materialized copy (single HBM->HBM DMA).
    """
    out = _identity_copy(z) if materialize else _identity_noop(z)
    log_dict: dict = {}  # abstract base class carries no regularization stats
    return out, log_dict


def get_trainable_parameters():
    # AbstractRegularizer declares this abstract; the base class owns no
    # parameters, so the faithful synthetic implementation yields nothing.
    return ()


if __name__ == "__main__":
    shape = (2, 4, 16, 16)  # (B, C, H, W) latent, NCHW like the PyTorch module
    key = jax.random.PRNGKey(0)
    z = jax.block_until_ready(jax.random.normal(key, shape, dtype=jnp.float32))

    # Default path: pure pass-through (no kernel, no copy, no donation).
    out_noop, log_noop = abstract_regularizer_forward(z)
    out_noop = jax.block_until_ready(out_noop)
    assert out_noop.shape == shape and out_noop.dtype == z.dtype
    assert bool(jnp.array_equal(out_noop, z))
    assert log_noop == {}

    # Materializing path: single HBM->HBM DMA copy (the Pallas kernel).
    out_copy, log_copy = abstract_regularizer_forward(z, materialize=True)
    out_copy = jax.block_until_ready(out_copy)
    assert out_copy.shape == shape and out_copy.dtype == z.dtype
    assert bool(jnp.array_equal(out_copy, z))
    assert log_copy == {}

    print("KERNEL_OK")
</pallas_src>

<mosaic_0001>
module attributes {stable_mosaic.version = 11 : i64} {
  func.func @_hbm_copy_kernel(%arg0: memref<2x4x16x16xf32, #tpu.memory_space<any>>, %arg1: memref<2x4x16x16xf32, #tpu.memory_space<any>>, %arg2: memref<!tpu.dma_semaphore, #tpu.memory_space<semaphore_mem>>) attributes {dimension_semantics = [], scalar_prefetch = 0 : i64, scratch_operands = 1 : i64, tpu.core_type = #tpu.core_type<tc>} {
    tpu.enqueue_dma source(%arg0 : memref<2x4x16x16xf32, #tpu.memory_space<any>>) target(%arg1 : memref<2x4x16x16xf32, #tpu.memory_space<any>>) target_semaphore(%arg2 : memref<!tpu.dma_semaphore, #tpu.memory_space<semaphore_mem>>)
    tpu.wait_dma2 semaphore(%arg2 : memref<!tpu.dma_semaphore, #tpu.memory_space<semaphore_mem>>) src(%arg0 : memref<2x4x16x16xf32, #tpu.memory_space<any>>) dst(%arg1 : memref<2x4x16x16xf32, #tpu.memory_space<any>>)
    return
  }
}

</mosaic_0001>

<bundles_post_ra>
// kernel: tpu_custom_call.1
= control target key start
LH: loop header
LB: loop body
LE: loop exit
PB: predicated region body
PF: predicated region fallthrough
CT: control target
= control target key end

     0   :  { %s34_s12 = smov [#allocation2]   ;;  %s35_s13 = smov [#allocation3]   ;;  %s53_s0 = inlined_call_operand.hbm [shape: f32[2,4,16,16], index: 0, kind: input, shape index: {}]   ;;  %s54_s1 = inlined_call_operand.hbm [shape: f32[2,4,16,16], index: 1, kind: output, shape index: {}]  }
   0x1   :  { %s10_s8 = sshll.u32 %s53_s0, 4  ;;  %s12_s11 = sshll.u32 %s54_s1, 4  ;;  %s11_s8 = int_to_ptr.hbm [resolvable:$true] %s10_s8  ;;  %s13_s11 = int_to_ptr.hbm [resolvable:$true] %s12_s11 }
   0x2   :  { %s36_s14 = smov 0  }
   0x3   :  { %16 = dma.general %s11_s8, 2048, %s13_s11, %s34_s12, %s35_s13, [#allocation4], %s36_s14, 0  }
   0x4   :  { %32 = dma.done.wait [#allocation2], 2048 }
   0x5   :  { %33 = vsyncadd [#allocation2], 4294965248 }
   0x6   :  { %22 = vsyncmov [#allocation2] }
   0x9   :  { %s23_s15 = vpop.sfrf %22 }
   0xa   :  { %p28_p0 = scmp.ne.s32.totalorder %s23_s15, 0 }
   0xc   :  { %27 = shalt.err (%p28_p0)  }

</bundles_post_ra>
